<compile_context>
chip_gen: v5e
topology: v5e:2x2
jax: 0.10.0
libtpu: 0.0.40
codegen_flags: <defaults>
</compile_context>

<pallas_src>
import functools

import jax
import jax.numpy as jnp
from jax.experimental import pallas as pl
from jax.experimental.pallas import tpu as pltpu


LANE = 128
OUT_SIZE = (32, 32)                      # cfg.training.transforms.resize.shape

# (layers, in_channel, mid_channel, out_channel) — small synthetic RSU config
ENCODER_CFG = [(7, 3, 4, 8), (6, 8, 4, 8), (5, 8, 8, 16),
               (4, 16, 8, 16), (4, 16, 8, 16), (4, 16, 8, 16)]
DECODER_CFG = [(4, 32, 8, 16), (4, 32, 8, 16), (5, 32, 8, 8),
               (6, 16, 4, 8), (7, 16, 4, 8)]


def _round_up(n, m):
    return ((n + m - 1) // m) * m


def _full_spec(shape):
    rank = len(shape)
    return pl.BlockSpec(tuple(shape), lambda *_, _r=rank: (0,) * _r)


# ----------------------------------------------------------------------------
# pltpu.roll convention probe (run once, outside jit)
# ----------------------------------------------------------------------------
@functools.lru_cache(maxsize=None)
def _roll_sign():
    """Returns +1 if pltpu.roll matches np.roll (out[i] = x[i - shift]),
    -1 for the opposite convention, so the tap shifts below are correct
    under either convention."""
    def kernel(x_ref, o_ref):
        o_ref[...] = pltpu.roll(x_ref[...], 1, 1)

    x = jnp.arange(8 * LANE, dtype=jnp.float32).reshape(8, LANE)
    y = pl.pallas_call(
        kernel, out_shape=jax.ShapeDtypeStruct((8, LANE), jnp.float32))(x)
    return 1 if float(jax.device_get(y)[0, 1]) == 0.0 else -1


# ----------------------------------------------------------------------------
# Fused stage kernel: conv3x3+ReLU -> conv3x3+ReLU (-> optional side conv3x3)
# ----------------------------------------------------------------------------
def _make_stage_kernel(n_in, has_side, shifts):
    """Activations are (C, NpadR) with NpadR = N*(H+2)*(W+2) rounded up to a
    multiple of 128 lanes.  The zero border makes every 3x3 tap a pure lane
    rotation; `mask` re-zeroes the border after each conv so the next conv
    sees correct 'same' zero padding.  The mid activation stays in VMEM."""

    def kernel(*refs):
        i = 0
        xs = [refs[i + k][...].astype(jnp.float32) for k in range(n_in)]
        i += n_in
        mask = refs[i][...]                       # (1, NpadR) f32, 1 on interior
        i += 1
        w1 = [refs[i + k] for k in range(n_in)]   # (9, Cmid, Cin_k) bf16
        i += n_in
        b1 = refs[i][...]; i += 1                 # (Cmid, 1) f32
        w2 = refs[i]; i += 1                      # (9, Cout, Cmid) bf16
        b2 = refs[i][...]; i += 1                 # (Cout, 1) f32
        if has_side:
            ws = refs[i]; i += 1                  # (9, 1, Cout) bf16
            bs = refs[i][...]; i += 1             # (1, 1) f32
        o_ref = refs[i]; i += 1
        s_ref = refs[i] if has_side else None

        def conv(x_list, w_list, bias):
            acc = None
            for t, sh in enumerate(shifts):
                for x32, wref in zip(x_list, w_list):
                    xt = x32 if sh == 0 else pltpu.roll(x32, sh, 1)
                    p = jnp.dot(wref[t], xt.astype(jnp.bfloat16),
                                preferred_element_type=jnp.float32)
                    acc = p if acc is None else acc + p
            return acc + bias

        mid = mask * jnp.maximum(conv(xs, w1, b1), 0.0)       # f32, VMEM only
        out = mask * jnp.maximum(conv([mid], [w2], b2), 0.0)
        o_ref[...] = out.astype(o_ref.dtype)
        if has_side:
            s_ref[...] = (mask * conv([out], [ws], bs)).astype(s_ref.dtype)

    return kernel


def _run_stage(xs, p, n, h, w, *, has_side, roll_sign):
    wp = w + 2
    npad = n * (h + 2) * wp
    npadr = _round_up(npad, LANE)
    # tap (dy, dx) reads flat position q + dy*Wp + dx  ->  roll amount:
    shifts = tuple(((-roll_sign) * (dy * wp + dx)) % npadr
                   for dy in (-1, 0, 1) for dx in (-1, 0, 1))
    mask = _interior_mask(n, h, w)
    cmid = p["b1"].shape[0]
    cout = p["b2"].shape[0]
    cin = sum(int(x.shape[0]) for x in xs)

    inputs = list(xs) + [mask] + list(p["w1"]) + [p["b1"], p["w2"], p["b2"]]
    if has_side:
        inputs += [p["ws"], p["bs"]]

    out_shape = [jax.ShapeDtypeStruct((cout, npadr), jnp.bfloat16)]
    out_specs = [_full_spec((cout, npadr))]
    if has_side:
        out_shape.append(jax.ShapeDtypeStruct((1, npadr), jnp.float32))
        out_specs.append(_full_spec((1, npadr)))

    flops = 2 * 9 * npadr * (cin * cmid + cmid * cout + (cout if has_side else 0))
    in_bytes = sum(int(a.size) * a.dtype.itemsize for a in inputs)
    out_bytes = cout * npadr * 2 + (npadr * 4 if has_side else 0)

    outs = pl.pallas_call(
        _make_stage_kernel(len(xs), has_side, shifts),
        grid=(1,),
        in_specs=[_full_spec(a.shape) for a in inputs],
        out_specs=tuple(out_specs) if has_side else out_specs[0],
        out_shape=tuple(out_shape) if has_side else out_shape[0],
        compiler_params=pltpu.CompilerParams(
            dimension_semantics=("arbitrary",)),
        cost_estimate=pl.CostEstimate(flops=flops, transcendentals=0,
                                      bytes_accessed=in_bytes + out_bytes),
    )(*inputs)
    if has_side:
        return outs[0], outs[1]
    return outs, None


# ----------------------------------------------------------------------------
# Fuse conv (1x1, 6 -> 1), lane-dense
# ----------------------------------------------------------------------------
def _fuse_kernel(x_ref, w_ref, b_ref, o_ref):
    o_ref[...] = (jnp.dot(w_ref[...], x_ref[...],
                          preferred_element_type=jnp.float32)
                  + b_ref[...]).astype(o_ref.dtype)


def _fuse_call(x, p):
    co, k = p["w"].shape
    rows = x.shape[1]
    return pl.pallas_call(
        _fuse_kernel,
        grid=(1,),
        in_specs=[_full_spec(x.shape), _full_spec(p["w"].shape),
                  _full_spec(p["b"].shape)],
        out_specs=_full_spec((co, rows)),
        out_shape=jax.ShapeDtypeStruct((co, rows), jnp.float32),
        compiler_params=pltpu.CompilerParams(
            dimension_semantics=("arbitrary",)),
        cost_estimate=pl.CostEstimate(
            flops=2 * co * k * rows, transcendentals=0,
            bytes_accessed=int(x.size) * 2 + k * co * 2 + co * rows * 4),
    )(x, p["w"], p["b"])


# ----------------------------------------------------------------------------
# Layout / resampling glue (plain JAX; PyTorch F.interpolate default = nearest)
# ----------------------------------------------------------------------------
def _pad_flatten(x):
    """(C, N, H, W) -> (C, NpadR) bf16: spatial zero-pad by 1, flatten, round
    the lane dim up to a multiple of 128 (lane-dense, zero tail)."""
    c, n, h, w = x.shape
    npad = n * (h + 2) * (w + 2)
    xp = jnp.pad(x, ((0, 0), (0, 0), (1, 1), (1, 1))).reshape(c, npad)
    xp = jnp.pad(xp, ((0, 0), (0, _round_up(npad, LANE) - npad)))
    return xp.astype(jnp.bfloat16)


def _unflatten(flat, n, h, w):
    """(C, NpadR) -> (C, N, H, W): strip the lane padding and the border."""
    c = flat.shape[0]
    hp, wp = h + 2, w + 2
    sp = flat[:, :n * hp * wp].reshape(c, n, hp, wp)
    return sp[:, :, 1:1 + h, 1:1 + w]


def _interior_mask(n, h, w):
    hp, wp = h + 2, w + 2
    npad = n * hp * wp
    m = jnp.zeros((1, n, hp, wp), jnp.float32)
    m = m.at[:, :, 1:1 + h, 1:1 + w].set(1.0).reshape(1, npad)
    return jnp.pad(m, ((0, 0), (0, _round_up(npad, LANE) - npad)))


def _downsample_flat(flat, n, h, w):     # interpolate(scale_factor=0.5), nearest
    return _pad_flatten(_unflatten(flat, n, h, w)[:, :, ::2, ::2])


def _upsample_flat(flat, n, h, w):       # interpolate(scale_factor=2.0), nearest
    sp = _unflatten(flat, n, h, w)
    return _pad_flatten(jnp.repeat(jnp.repeat(sp, 2, axis=2), 2, axis=3))


def _side_to_mask(sflat, n, h, w):       # upsample(side, size=OUT_SIZE), nearest
    m = jnp.transpose(_unflatten(sflat, n, h, w), (1, 0, 2, 3))   # (N,1,h,w)
    ho, wo = OUT_SIZE
    if ho % h == 0 and wo % w == 0:
        return jnp.repeat(jnp.repeat(m, ho // h, axis=2), wo // w, axis=3)
    ih = (jnp.arange(ho) * h) // ho
    iw = (jnp.arange(wo) * w) // wo
    return m[:, :, ih][:, :, :, iw]


# ----------------------------------------------------------------------------
# Parameters (deterministic, synthetic) + one-time kernel-layout preprocessing
# ----------------------------------------------------------------------------
def _xavier(key, kh, kw, cin, cout):
    fan_in, fan_out = cin * kh * kw, cout * kh * kw
    limit = (6.0 / (fan_in + fan_out)) ** 0.5
    return jax.random.uniform(key, (kh, kw, cin, cout), jnp.float32, -limit, limit)


def _conv_params(key, kh, kw, cin, cout):
    return {"w": _xavier(key, kh, kw, cin, cout),
            "b": jnp.zeros((cout,), jnp.float32)}


def _stage_params(key, cin, cmid, cout):
    k1, k2 = jax.random.split(key)
    p1 = _conv_params(k1, 3, 3, cin, cmid)
    p2 = _conv_params(k2, 3, 3, cmid, cout)
    return {"w1": p1["w"], "b1": p1["b"], "w2": p2["w"], "b2": p2["b"]}


def init_params(key):
    keys = jax.random.split(key, len(ENCODER_CFG) + 2 * len(DECODER_CFG) + 1)
    ki = iter(keys)
    enc = [_stage_params(next(ki), c[1], c[2], c[3]) for c in ENCODER_CFG]
    dec = [_stage_params(next(ki), c[1], c[2], c[3]) for c in DECODER_CFG]
    side = [_conv_params(next(ki), 3, 3, c[3], 1) for c in DECODER_CFG]
    side = [side[0]] + side              # side_stages.insert(0, side_stages[0])
    fuse = _conv_params(next(ki), 1, 1, 6, 1)     # side_fuse: 6 -> 1, kernel 1
    return {"encoder": enc, "decoder": dec, "side": side, "fuse": fuse}


def preprocess_params(params):
    """One-time conversion (outside the jitted forward) to the kernel layout:
    weights -> bf16 (KH*KW, Cout, Cin); biases -> f32 (Cout, 1); decoder conv1
    weights split into (upsampled, skip) halves; each side head attached to
    the stage kernel that produces its feature."""
    def wconv(w):
        kh, kw, ci, co = w.shape
        return jnp.transpose(w, (0, 1, 3, 2)).reshape(kh * kw, co, ci
                                                      ).astype(jnp.bfloat16)

    def bcol(b):
        return b.astype(jnp.float32).reshape(-1, 1)

    enc = [{"w1": [wconv(p["w1"])], "b1": bcol(p["b1"]),
            "w2": wconv(p["w2"]), "b2": bcol(p["b2"])}
           for p in params["encoder"]]
    enc[-1]["ws"] = wconv(params["side"][0]["w"])      # shared side[0]
    enc[-1]["bs"] = bcol(params["side"][0]["b"])

    up_channels = [ENCODER_CFG[-1][3]] + [c[3] for c in DECODER_CFG[:-1]]
    dec = []
    for i, p in enumerate(params["decoder"]):
        cu = up_channels[i]
        dec.append({"w1": [wconv(p["w1"][:, :, :cu, :]),
                           wconv(p["w1"][:, :, cu:, :])],
                    "b1": bcol(p["b1"]),
                    "w2": wconv(p["w2"]), "b2": bcol(p["b2"]),
                    "ws": wconv(params["side"][i + 1]["w"]),
                    "bs": bcol(params["side"][i + 1]["b"])})

    fuse = {"w": jnp.transpose(params["fuse"]["w"], (0, 1, 3, 2)
                               ).reshape(1, 6).astype(jnp.bfloat16),
            "b": bcol(params["fuse"]["b"])}
    return {"encoder": enc, "decoder": dec, "fuse": fuse}


# ----------------------------------------------------------------------------
# U2Net forward
# ----------------------------------------------------------------------------
def u2net_forward(x_nchw, kp, *, roll_sign=1):
    n, _, h, w = x_nchw.shape

    # encoder (channels-first, padded-flattened, bf16 activations)
    cur = _pad_flatten(jnp.transpose(x_nchw, (1, 0, 2, 3)))
    cur_hw = (h, w)
    enc_feats = []
    bottleneck_side = None
    for si, p in enumerate(kp["encoder"]):
        hh, ww = cur_hw
        last = si == len(kp["encoder"]) - 1
        out, side = _run_stage([cur], p, n, hh, ww,
                               has_side=last, roll_sign=roll_sign)
        enc_feats.append((out, hh, ww))
        if last:
            bottleneck_side = (side, hh, ww)
        else:
            cur = _downsample_flat(out, n, hh, ww)
            cur_hw = (hh // 2, ww // 2)

    # decoder (skip features are already in the kernel layout: zero glue;
    # the channel concat is folded into the stage kernel)
    sides = [bottleneck_side]
    prev, ph, pw = enc_feats[-1]
    skips = enc_feats[:-1]
    for p in kp["decoder"]:
        skip, sh, sw = skips.pop()
        x_up = _upsample_flat(prev, n, ph, pw)            # (ph,pw) -> (sh,sw)
        out, side = _run_stage([x_up, skip], p, n, sh, sw,
                               has_side=True, roll_sign=roll_sign)
        sides.append((side, sh, sw))
        prev, ph, pw = out, sh, sw

    # side masks (NCHW) + fused output
    masks = [_side_to_mask(s, n, sh, sw) for s, sh, sw in sides]
    rows = n * OUT_SIZE[0] * OUT_SIZE[1]
    fuse_x = jnp.transpose(jnp.concatenate(masks, axis=1),
                           (1, 0, 2, 3)).reshape(len(masks), rows)
    fused = _fuse_call(fuse_x.astype(jnp.bfloat16), kp["fuse"])
    outputs = jnp.transpose(fused.reshape(1, n, *OUT_SIZE), (1, 0, 2, 3))
    return masks, outputs


if __name__ == "__main__":
    key = jax.random.PRNGKey(0)
    kparams, kx = jax.random.split(key)
    params = preprocess_params(init_params(kparams))
    x = jax.random.normal(kx, (2, 3, 32, 32), jnp.float32)        # NCHW input

    sign = _roll_sign()                 # probe pltpu.roll's convention once
    fwd = jax.jit(functools.partial(u2net_forward, roll_sign=sign))
    masks, fused = fwd(x, params)
    jax.block_until_ready((masks, fused))

    assert fused.shape == (2, 1, 32, 32)
    assert len(masks) == 6 and all(m.shape == (2, 1, 32, 32) for m in masks)
    print("KERNEL_OK")
</pallas_src>

<mosaic_0001>
module attributes {stable_mosaic.version = 11 : i64} {
  func.func @kernel(%arg0: memref<8x128xf32, #tpu.memory_space<vmem>>, %arg1: memref<8x128xf32, #tpu.memory_space<vmem>>) attributes {dimension_semantics = [], scalar_prefetch = 0 : i64, scratch_operands = 0 : i64, tpu.core_type = #tpu.core_type<tc>} {
    %c0 = arith.constant 0 : index
    %c0_0 = arith.constant 0 : index
    %0 = vector.load %arg0[%c0, %c0_0] : memref<8x128xf32, #tpu.memory_space<vmem>>, vector<8x128xf32>
    %c1_i32 = arith.constant 1 : i32
    %1 = tpu.dynamic_rotate %0 by %c1_i32 dim 1 : vector<8x128xf32>, i32 -> vector<8x128xf32>
    %c0_1 = arith.constant 0 : index
    %c0_2 = arith.constant 0 : index
    %2 = vector.load %arg1[%c0_1, %c0_2] : memref<8x128xf32, #tpu.memory_space<vmem>>, vector<8x128xf32>
    tpu.vector_store %arg1[%c0_1, %c0_2], %1 {strides = array<i32>} : memref<8x128xf32, #tpu.memory_space<vmem>>, vector<8x128xf32>,
    return
  }
}

</mosaic_0001>

<bundles_post_ra>
// kernel: tpu_custom_call.1
= control target key start
LH: loop header
LB: loop body
LE: loop exit
PB: predicated region body
PF: predicated region fallthrough
CT: control target
= control target key end

     0   :  { %6 = vsyncpa [#allocation3], 0  ;;  %s118_s0 = inlined_call_operand.hbm [shape: f32[8,128], index: 0, kind: input, shape index: {}]   ;;  %s119_s1 = inlined_call_operand.hbm [shape: f32[8,128], index: 1, kind: output, shape index: {}]  }
   0x1   :  { %7 = vsyncpa [#allocation4], 0  ;;  %s13_s8 = sshll.u32 %s118_s0, 4  ;;  %s99_s9 = smov [#allocation2]   ;;  %s14_s8 = int_to_ptr.hbm [resolvable:$true] %s13_s8 }
   0x2   :  { %s15_s10 = sshll.u32 %s99_s9, 4  ;;  %s16_s10 = int_to_ptr.vmem [resolvable:$true] %s15_s10 }
   0x3   :  { %18 = dma.hbm_to_vmem [thread:$0]  %s14_s8, 128, %s16_s10, [#allocation3]  }
   0x4   :  { %95 = dma.done.wait [#allocation3], 128  }
   0x5   :  { %96 = vsyncadd [#allocation3], 4294967168  ;;  %v23_v0 = vld [vmem:[#allocation2] sm:$0xff]  ;;  %s100_s11 = smov 1   ;;  %s101_s12 = smov [#allocation5]  }
   0x6   :  { %24 = vrot.lane.b32.xlu0 %v23_v0, %s100_s11  ;;  %s32_s13 = sshll.u32 %s101_s12, 4  ;;  %s34_s16 = sshll.u32 %s119_s1, 4  ;;  %s33_s13 = int_to_ptr.vmem [resolvable:$true] %s32_s13  ;;  %s35_s16 = int_to_ptr.hbm [resolvable:$true] %s34_s16 }
  0x78   :  { %v25_v1 = vpop.permute.xlu0 %24 }
  0x79   :  { %26 = vst [vmem:[#allocation5] sm:$0xff] %v25_v1 }
  0x7a   :  { %37 = dma.vmem_to_hbm [thread:$0]  %s33_s13, 128, %s35_s16, [#allocation4]  }
  0x7b   :  { %97 = dma.done.wait [#allocation4], 128  }
  0x7c   :  { %98 = vsyncadd [#allocation4], 4294967168 }
  0x7d   :  { %42 = vsyncpa [#allocation3], 1 }
  0x7e   :  { %43 = vsyncpa [#allocation4], 1 }

</bundles_post_ra>
